<compile_context>
chip_gen: v6e
topology: v6e:2x2x1
jax: 0.10.0
libtpu: 0.0.40
codegen_flags: <defaults>
</compile_context>

<pallas_src>
import math

import jax
import jax.numpy as jnp
from jax.experimental import pallas as pl
from jax.experimental.pallas import tpu as pltpu

EPS = 1e-06
LANES = 128
SUBLANES = 8
TM_MAX = 4096       # rows per grid step per core; sweep 2048/4096/8192 per chip
NUM_CORES = 2       # core-parallel split (v7x megacore); serial on v5e/v6e


def _round_up(x, m):
    return -(-x // m) * m


def _make_focal_kernel(gamma, ignore_index, tm):
    g = float(gamma)
    g_int = int(round(g))
    int_gamma = abs(g - g_int) < 1e-12 and 0 <= g_int <= 8

    def kernel(o_ref, t_ref, sum_ref, cnt_ref):
        # per-core accumulator slots: init once per core at reduction step 0
        @pl.when(pl.program_id(1) == 0)
        def _():
            sum_ref[...] = jnp.zeros_like(sum_ref)
            cnt_ref[...] = jnp.zeros_like(cnt_ref)

        o = o_ref[...].astype(jnp.float32)
        t = t_ref[...].astype(jnp.float32)

        # ignore-mask on *raw* targets (before clamping), like the PyTorch code.
        # Wrapper pads targets with ignore_index, so this also masks padding —
        # no per-step iota/tail-mask work needed.
        cnt = (t != ignore_index).astype(jnp.float32)

        oc = jnp.clip(o, EPS, 1.0 - EPS)
        tc = jnp.clip(t, EPS, 1.0 - EPS)
        pt = (1.0 - tc) * (1.0 - oc) + tc * oc
        one_m_pt = 1.0 - pt
        if int_gamma:
            # integer gamma: repeated multiplies instead of pow (EUP relief)
            w = jnp.ones_like(pt) if g_int == 0 else one_m_pt
            for _ in range(max(g_int - 1, 0)):
                w = w * one_m_pt
        else:
            w = one_m_pt ** g

        # accumulate +w*log(pt); the single global negation happens in the
        # wrapper.  Multiplying by cnt zeroes ignored and padded elements
        # (all values are finite thanks to the clamps, so no NaN leakage).
        loss = w * jnp.log(pt) * cnt

        # reduce (tm, 128) -> (1, 8, 128) with cheap VPU adds so accumulators
        # stay a single vreg-sized, lane-dense block per core.
        sum_ref[...] += loss.reshape(1, tm // SUBLANES, SUBLANES, LANES).sum(axis=1)
        cnt_ref[...] += cnt.reshape(1, tm // SUBLANES, SUBLANES, LANES).sum(axis=1)

    return kernel


def focal_loss_2d(outputs, targets, gamma=2.0, ignore_index=255):
    """outputs: probabilities, any shape (e.g. NCHW). targets: same shape.

    Inputs are streamed in their native dtype (f32/bf16 outputs, uint8/int
    or float targets) and upcast to f32 inside VMEM.
    """
    assert outputs.shape == targets.shape
    n = math.prod(outputs.shape)

    # flatten in native dtype (free reshape of a contiguous array, no astype)
    o = outputs.reshape(-1)
    t = targets.reshape(-1)

    rows = -(-n // LANES)                       # ceil(n / 128)
    per_core = -(-rows // NUM_CORES)

    # align tm for packed sublane layouts of narrow dtypes (bf16: 16, int8: 32)
    itemsize = min(jnp.dtype(outputs.dtype).itemsize,
                   jnp.dtype(targets.dtype).itemsize)
    row_align = SUBLANES * max(1, 4 // max(itemsize, 1))
    tm = min(TM_MAX, _round_up(per_core, row_align))
    steps = -(-per_core // tm)
    rows_total = NUM_CORES * steps * tm
    n_total = rows_total * LANES

    pad = n_total - n
    if pad:
        # Pad targets with ignore_index so padded elements are dropped by the
        # in-kernel `t != ignore_index` check (no tail-mask ops in the kernel);
        # pad outputs with 0.5 so clip/log stay finite.  Note jnp.pad copies —
        # for exactly-tiling inputs (the common segmentation case) pad == 0
        # and the inputs are streamed straight from their original buffers.
        o = jnp.pad(o, (0, pad), constant_values=0.5)
        t = jnp.pad(t, (0, pad), constant_values=ignore_index)

    o2 = o.reshape(rows_total, LANES)
    t2 = t.reshape(rows_total, LANES)

    kernel = _make_focal_kernel(float(gamma), float(ignore_index), tm)

    sum_blk, cnt_blk = pl.pallas_call(
        kernel,
        out_shape=(
            jax.ShapeDtypeStruct((NUM_CORES, SUBLANES, LANES), jnp.float32),
            jax.ShapeDtypeStruct((NUM_CORES, SUBLANES, LANES), jnp.float32),
        ),
        grid_spec=pltpu.PrefetchScalarGridSpec(
            num_scalar_prefetch=0,
            grid=(NUM_CORES, steps),
            in_specs=[
                pl.BlockSpec((tm, LANES), lambda c, i: (c * steps + i, 0)),
                pl.BlockSpec((tm, LANES), lambda c, i: (c * steps + i, 0)),
            ],
            out_specs=[
                pl.BlockSpec((1, SUBLANES, LANES), lambda c, i: (c, 0, 0)),
                pl.BlockSpec((1, SUBLANES, LANES), lambda c, i: (c, 0, 0)),
            ],
        ),
        compiler_params=pltpu.CompilerParams(
            # leading axis split across TensorCores (2x on v7x), reduction axis
            # stays a serial loop with resident per-core accumulators
            dimension_semantics=("parallel", "arbitrary"),
            # double-buffered inputs at tm=4096 need ~8 MiB (f32); raise the
            # scoped-VMEM limit so v5e's 16 MiB default never binds.
            vmem_limit_bytes=32 * 1024 * 1024,
        ),
    )(o2, t2)

    total = jnp.sum(sum_blk)          # sum of +w*log(pt) over non-ignored elems
    count = jnp.sum(cnt_blk)          # number of non-ignored elems
    # NOTE: returns NaN when every element is ignored (count == 0), matching
    # the PyTorch reference behavior.
    return (-total / count).astype(jnp.float32)


def _reference_focal_loss(outputs, targets, gamma=2.0, ignore_index=255):
    o = outputs.reshape(-1).astype(jnp.float32)
    t = targets.reshape(-1).astype(jnp.float32)
    mask = t != ignore_index
    oc = jnp.clip(o, EPS, 1.0 - EPS)
    tc = jnp.clip(t, EPS, 1.0 - EPS)
    pt = (1.0 - tc) * (1.0 - oc) + tc * oc
    loss = -((1.0 - pt) ** gamma) * jnp.log(pt)
    return jnp.sum(jnp.where(mask, loss, 0.0)) / jnp.sum(mask.astype(jnp.float32))


if __name__ == "__main__":
    key = jax.random.PRNGKey(0)
    k1, k2, k3 = jax.random.split(key, 3)

    # outputs: probabilities in (0,1), NCHW layout
    outputs = jax.random.uniform(k1, (2, 4, 16, 16), dtype=jnp.float32)
    # targets: binary labels, with some pixels set to ignore_index (255)
    targets = jax.random.bernoulli(k2, 0.5, (2, 4, 16, 16)).astype(jnp.float32)
    ignore_mask = jax.random.bernoulli(k3, 0.1, (2, 4, 16, 16))
    targets = jnp.where(ignore_mask, jnp.float32(255.0), targets)

    loss = focal_loss_2d(outputs, targets, gamma=2.0, ignore_index=255)
    jax.block_until_ready(loss)

    ref = _reference_focal_loss(outputs, targets, gamma=2.0, ignore_index=255)
    assert jnp.allclose(loss, ref, rtol=1e-4, atol=1e-6), (loss, ref)

    print("KERNEL_OK")
</pallas_src>

<mosaic_0001>
module attributes {stable_mosaic.version = 11 : i64} {
  func.func @kernel(%arg0: i32, %arg1: i32, %arg2: memref<8x128xf32, #tpu.memory_space<vmem>>, %arg3: memref<8x128xf32, #tpu.memory_space<vmem>>, %arg4: memref<1x8x128xf32, #tpu.memory_space<vmem>>, %arg5: memref<1x8x128xf32, #tpu.memory_space<vmem>>) attributes {dimension_semantics = [#tpu.dimension_semantics<parallel>, #tpu.dimension_semantics<arbitrary>], iteration_bounds = array<i64: 2, 1>, scalar_prefetch = 0 : i64, scratch_operands = 0 : i64, tpu.core_type = #tpu.core_type<tc>, window_params = [{transform_indices = @transform_0, window_bounds = array<i64: 8, 128>}, {transform_indices = @transform_1, window_bounds = array<i64: 8, 128>}, {transform_indices = @transform_2, window_bounds = array<i64: 1, 8, 128>}, {transform_indices = @transform_3, window_bounds = array<i64: 1, 8, 128>}]} {
    %c0_i32 = arith.constant 0 : i32
    %0 = arith.cmpi eq, %arg1, %c0_i32 : i32
    %1 = arith.extui %0 : i1 to i32
    %c0_i32_0 = arith.constant 0 : i32
    %2 = arith.cmpi ne, %1, %c0_i32_0 : i32
    scf.if %2 {
      %cst_25 = arith.constant 0.000000e+00 : f32
      %40 = vector.broadcast %cst_25 : f32 to vector<1x8x128xf32>
      %c0_26 = arith.constant 0 : index
      %c0_27 = arith.constant 0 : index
      %c0_28 = arith.constant 0 : index
      %41 = vector.load %arg4[%c0_26, %c0_27, %c0_28] : memref<1x8x128xf32, #tpu.memory_space<vmem>>, vector<1x8x128xf32>
      tpu.vector_store %arg4[%c0_26, %c0_27, %c0_28], %40 {strides = array<i32>} : memref<1x8x128xf32, #tpu.memory_space<vmem>>, vector<1x8x128xf32>,
      %cst_29 = arith.constant 0.000000e+00 : f32
      %42 = vector.broadcast %cst_29 : f32 to vector<1x8x128xf32>
      %c0_30 = arith.constant 0 : index
      %c0_31 = arith.constant 0 : index
      %c0_32 = arith.constant 0 : index
      %43 = vector.load %arg5[%c0_30, %c0_31, %c0_32] : memref<1x8x128xf32, #tpu.memory_space<vmem>>, vector<1x8x128xf32>
      tpu.vector_store %arg5[%c0_30, %c0_31, %c0_32], %42 {strides = array<i32>} : memref<1x8x128xf32, #tpu.memory_space<vmem>>, vector<1x8x128xf32>,
    } else {
    }
    %c0 = arith.constant 0 : index
    %c0_1 = arith.constant 0 : index
    %3 = vector.load %arg2[%c0, %c0_1] : memref<8x128xf32, #tpu.memory_space<vmem>>, vector<8x128xf32>
    %c0_2 = arith.constant 0 : index
    %c0_3 = arith.constant 0 : index
    %4 = vector.load %arg3[%c0_2, %c0_3] : memref<8x128xf32, #tpu.memory_space<vmem>>, vector<8x128xf32>
    %cst = arith.constant 2.550000e+02 : f32
    %5 = vector.broadcast %cst : f32 to vector<8x128xf32>
    %6 = arith.cmpf one, %4, %5 : vector<8x128xf32>
    %7 = arith.extui %6 : vector<8x128xi1> to vector<8x128xi32>
    %8 = arith.sitofp %7 : vector<8x128xi32> to vector<8x128xf32>
    %cst_4 = arith.constant 9.99999997E-7 : f32
    %cst_5 = arith.constant 0.999998986 : f32
    %9 = vector.broadcast %cst_4 : f32 to vector<8x128xf32>
    %10 = arith.maximumf %9, %3 : vector<8x128xf32>
    %11 = vector.broadcast %cst_5 : f32 to vector<8x128xf32>
    %12 = arith.minimumf %11, %10 : vector<8x128xf32>
    %cst_6 = arith.constant 9.99999997E-7 : f32
    %cst_7 = arith.constant 0.999998986 : f32
    %13 = vector.broadcast %cst_6 : f32 to vector<8x128xf32>
    %14 = arith.maximumf %13, %4 : vector<8x128xf32>
    %15 = vector.broadcast %cst_7 : f32 to vector<8x128xf32>
    %16 = arith.minimumf %15, %14 : vector<8x128xf32>
    %cst_8 = arith.constant 1.000000e+00 : f32
    %17 = vector.broadcast %cst_8 : f32 to vector<8x128xf32>
    %18 = arith.subf %17, %16 : vector<8x128xf32>
    %cst_9 = arith.constant 1.000000e+00 : f32
    %19 = vector.broadcast %cst_9 : f32 to vector<8x128xf32>
    %20 = arith.subf %19, %12 : vector<8x128xf32>
    %21 = arith.mulf %18, %20 : vector<8x128xf32>
    %22 = arith.mulf %16, %12 : vector<8x128xf32>
    %23 = arith.addf %21, %22 : vector<8x128xf32>
    %cst_10 = arith.constant 1.000000e+00 : f32
    %24 = vector.broadcast %cst_10 : f32 to vector<8x128xf32>
    %25 = arith.subf %24, %23 : vector<8x128xf32>
    %26 = arith.mulf %25, %25 : vector<8x128xf32>
    %27 = math.log %23 : vector<8x128xf32>
    %28 = arith.mulf %26, %27 : vector<8x128xf32>
    %29 = arith.mulf %28, %8 : vector<8x128xf32>
    %c0_11 = arith.constant 0 : index
    %c0_12 = arith.constant 0 : index
    %c0_13 = arith.constant 0 : index
    %30 = vector.load %arg4[%c0_11, %c0_12, %c0_13] : memref<1x8x128xf32, #tpu.memory_space<vmem>>, vector<1x8x128xf32>
    %31 = vector.shape_cast %29 : vector<8x128xf32> to vector<1x1x8x128xf32>
    %cst_14 = arith.constant dense<0.000000e+00> : vector<1x8x128xf32>
    %32 = vector.multi_reduction <add>, %31, %cst_14 [1] : vector<1x1x8x128xf32> to vector<1x8x128xf32>
    %33 = arith.addf %30, %32 : vector<1x8x128xf32>
    %c0_15 = arith.constant 0 : index
    %c0_16 = arith.constant 0 : index
    %c0_17 = arith.constant 0 : index
    %34 = vector.load %arg4[%c0_15, %c0_16, %c0_17] : memref<1x8x128xf32, #tpu.memory_space<vmem>>, vector<1x8x128xf32>
    tpu.vector_store %arg4[%c0_15, %c0_16, %c0_17], %33 {strides = array<i32>} : memref<1x8x128xf32, #tpu.memory_space<vmem>>, vector<1x8x128xf32>,
    %c0_18 = arith.constant 0 : index
    %c0_19 = arith.constant 0 : index
    %c0_20 = arith.constant 0 : index
    %35 = vector.load %arg5[%c0_18, %c0_19, %c0_20] : memref<1x8x128xf32, #tpu.memory_space<vmem>>, vector<1x8x128xf32>
    %36 = vector.shape_cast %8 : vector<8x128xf32> to vector<1x1x8x128xf32>
    %cst_21 = arith.constant dense<0.000000e+00> : vector<1x8x128xf32>
    %37 = vector.multi_reduction <add>, %36, %cst_21 [1] : vector<1x1x8x128xf32> to vector<1x8x128xf32>
    %38 = arith.addf %35, %37 : vector<1x8x128xf32>
    %c0_22 = arith.constant 0 : index
    %c0_23 = arith.constant 0 : index
    %c0_24 = arith.constant 0 : index
    %39 = vector.load %arg5[%c0_22, %c0_23, %c0_24] : memref<1x8x128xf32, #tpu.memory_space<vmem>>, vector<1x8x128xf32>
    tpu.vector_store %arg5[%c0_22, %c0_23, %c0_24], %38 {strides = array<i32>} : memref<1x8x128xf32, #tpu.memory_space<vmem>>, vector<1x8x128xf32>,
    return
  }
  func.func @transform_0(%arg0: i32, %arg1: i32) -> (i32, i32) {
    %c1_i32 = arith.constant 1 : i32
    %0 = arith.muli %arg0, %c1_i32 : i32
    %1 = arith.addi %0, %arg1 : i32
    %c0_i32 = arith.constant 0 : i32
    %c0_i32_0 = arith.constant 0 : i32
    return %1, %c0_i32 : i32, i32
  }
  func.func @transform_1(%arg0: i32, %arg1: i32) -> (i32, i32) {
    %c1_i32 = arith.constant 1 : i32
    %0 = arith.muli %arg0, %c1_i32 : i32
    %1 = arith.addi %0, %arg1 : i32
    %c0_i32 = arith.constant 0 : i32
    %c0_i32_0 = arith.constant 0 : i32
    return %1, %c0_i32 : i32, i32
  }
  func.func @transform_2(%arg0: i32, %arg1: i32) -> (i32, i32, i32) {
    %c0_i32 = arith.constant 0 : i32
    %c0_i32_0 = arith.constant 0 : i32
    %c0_i32_1 = arith.constant 0 : i32
    return %arg0, %c0_i32, %c0_i32_0 : i32, i32, i32
  }
  func.func @transform_3(%arg0: i32, %arg1: i32) -> (i32, i32, i32) {
    %c0_i32 = arith.constant 0 : i32
    %c0_i32_0 = arith.constant 0 : i32
    %c0_i32_1 = arith.constant 0 : i32
    return %arg0, %c0_i32, %c0_i32_0 : i32, i32, i32
  }
}

</mosaic_0001>

<bundles_post_ra>
// kernel: tpu_custom_call.1
= control target key start
LH: loop header
LB: loop body
LE: loop exit
PB: predicated region body
PF: predicated region fallthrough
CT: control target
= control target key end

     0   :  { %9 = vsyncpa [#allocation3], 0  ;;  %s946_s0 = inlined_call_operand.hbm [shape: f32[16,128], index: 0, kind: input, shape index: {}]   ;;  %s947_s1 = inlined_call_operand.hbm [shape: f32[16,128], index: 1, kind: input, shape index: {}]   ;;  %s948_s2 = inlined_call_operand.hbm [shape: f32[2,8,128], index: 2, kind: output, shape index: {0}]   ;;  %s949_s3 = inlined_call_operand.hbm [shape: f32[2,8,128], index: 3, kind: output, shape index: {1}]  }
   0x1   :  { %11 = vsyncpa [#allocation3 + $0x1], 0 }
   0x2   :  { %12 = vsyncpa [#allocation6], 0 }
   0x3   :  { %14 = vsyncpa [#allocation6 + $0x1], 0 }
   0x4   :  { %15 = vsyncpa [#allocation4], 0 }
   0x5   :  { %17 = vsyncpa [#allocation4 + $0x1], 0 }
   0x6   :  { %18 = vsyncpa [#allocation9], 0 }
   0x7   :  { %20 = vsyncpa [#allocation9 + $0x1], 0  ;;  %s747_s12 = smov 0   ;;  %s749_s13 = smov 0  }
   0x8   :  { %s751_s14 = smov 0   ;;  %s753_s15 = smov 0  }
   0x9   :  { %s755_s16 = smov 0   ;;  %s757_s17 = smov 0  }
   0xa LB: > { %s455_s18 = sadd.s32 4294967295, %s720_s17   ;;  %s456_s19 = sadd.s32 4294967294, %s720_s17   ;;  %s720_s17 = sphi %s757_s17, %s26_s17   ;;  %s716_s16 = sphi %s755_s16, %s961_s16   ;;  %s712_s15 = sphi %s753_s15, %s960_s15   ;;  %s708_s14 = sphi %s751_s14, %s959_s14   ;;  %s704_s13 = sphi %s749_s13, %s958_s13   ;;  %s700_s12 = sphi %s747_s12, %s957_s12  }
   0xb   : > { %s38_s20 = sadd.s32 1, %s716_s16  ;;  %s47_s21 = sadd.s32 1, %s708_s14 }
   0xc   : > { %p40_p0 = scmp.ge.s32.totalorder %s38_s20, 2  ;;  %p54_p1 = scmp.ne.s32.totalorder %s708_s14, %s704_s13 }
   0xd   : > { %p55_p2 = scmp.eq.s32.totalorder %s720_s17, 0  ;;  %p60_p3 = scmp.ne.s32.totalorder %s704_s13, %s700_s12 }
   0xe   : > { %s963_s20 = smov (%p40_p0, %s38_s20), 0  ;;  %p61_p5 = scmp.eq.s32.totalorder %s455_s18, 0 }
   0xf   : > { %p788_p4 = por %p55_p2, %p54_p1  ;;  %s44_s23 = ssub.s32 %s716_s16, %s963_s20 }
  0x10   : > { %p112_p6 = scmp.eq.s32.totalorder %s455_s18, 1  ;;  %p45_p7 = scmp.eq.s32.totalorder %s44_s23, 0 }
  0x11   : > { %p794_p8 = por %p61_p5, %p60_p3  ;;  %p118_p10 = scmp.eq.s32.totalorder %s456_s19, 1 }
  0x12   : > { %p798_p9 = por %p112_p6, %p54_p1  ;;  %p497_p13 = scmp.lt.s32.totalorder %s720_s17, 2 }
  0x13   : > { %s803_s26 = scalar_select %p45_p7, %s708_s14, %s47_s21  }
  0x14   : > { %p805_p11 = por %p118_p10, %p60_p3  ;;  %s812_s28 = sand.u32 1, %s708_s14  }
  0x15   : > { %s459_s29 = sshll.u32 %s812_s28, 3  ;;  %s460_s30 = sshll.u32 %s716_s16, 7 }
  0x16   : > { %s174_s6 = scalar_lea.hbm %s946_s0, %s460_s30  ;;  %s168_s7 = scalar_lea.vmem [#allocation2], %s459_s29 }
  0x17   : > { %s176_s8 = sshll.u32 %s168_s7, 4  ;;  %p821_p0 = pnand %p497_p13, %p788_p4  ;;  %s177_s8 = int_to_ptr.vmem [resolvable:$true] %s176_s8 }
  0x18   : > { %p463_p1 = scmp.ge.s32.totalorder %s720_s17, 1  ;;  %p200_p2 = scmp.lt.s32.totalorder %s720_s17, 3 }
  0x19   : > { %s165_s10 = scalar_lea.sflag [#allocation3], %s812_s28  ;;  %p552_p3 = pneg %p821_p0 }
  0x1a   : > { %s563_s11 = scalar_lea.vmem %s177_s8, 128  ;;  %s722_s18 = smov [#allocation2]  }
  0x1b   : > { %p564_p5 = scmp.ne.s32.totalorder %s177_s8, %s563_s11  ;;  %s568_s19 = sshll.u32 %s722_s18, 4  ;;  %s569_s19 = int_to_ptr.vmem [resolvable:$false] %s568_s19 }
  0x1c   : > { %s570_s21 = scalar_lea.vmem %s569_s19, 256  ;;  %p571_p4 = scmp.lt.s32.totalorder %s177_s8, %s569_s19 }
  0x1d   : > { %p566_p6 = pnand %p564_p5, %p552_p3  ;;  %p572_p10 = scmp.lt.s32.totalorder %s570_s21, %s563_s11 }
  0x1f   : > { %p567_p7 = pneg %p566_p6  ;;  %p573_p13 = por %p572_p10, %p571_p4 }
  0x21   : > { %p574_p12 = pnand %p573_p13, %p567_p7 }
  0x23   : > { %577 = shalt.err (!%p574_p12)
}
  0x24   : > { %486 = dma.hbm_to_vmem [thread:$0]  (!%p821_p0), %s174_s6, 128, %s177_s8, %s165_s10  }
  0x25   : > { %p839_p5 = pnand %p463_p1, %p200_p2  ;;  %s193_s5 = scalar_lea.hbm %s947_s1, %s460_s30 }
  0x26   : > { %s187_s7 = scalar_lea.vmem [#allocation5], %s459_s29  ;;  %s184_s18 = scalar_lea.sflag [#allocation6], %s812_s28 }
  0x27   : > { %s195_s11 = sshll.u32 %s187_s7, 4  ;;  %s723_s6 = smov [#allocation5]   ;;  %s196_s11 = int_to_ptr.vmem [resolvable:$true] %s195_s11 }
  0x28   : > { %s591_s19 = scalar_lea.vmem %s196_s11, 128  ;;  %s596_s8 = sshll.u32 %s723_s6, 4  ;;  %s597_s8 = int_to_ptr.vmem [resolvable:$false] %s596_s8 }
  0x29   : > { %p592_p12 = scmp.ne.s32.totalorder %s196_s11, %s591_s19  ;;  %s598_s10 = scalar_lea.vmem %s597_s8, 256 }
  0x2a   : > { %p599_p1 = scmp.lt.s32.totalorder %s196_s11, %s597_s8  ;;  %p600_p2 = scmp.lt.s32.totalorder %s598_s10, %s591_s19 }
  0x2b   : > { %p594_p6 = pnand %p592_p12, %p552_p3 }
  0x2c   : > { %p601_p4 = por %p600_p2, %p599_p1 }
  0x2d   : > { %p595_p7 = pneg %p594_p6 }
  0x2f   : > { %p602_p10 = pnand %p601_p4, %p595_p7 }
  0x31   : > { %605 = shalt.err (!%p602_p10)
}
  0x32   : > { %489 = dma.hbm_to_vmem [thread:$0]  (!%p821_p0), %s193_s5, 128, %s196_s11, %s184_s18  }
  0x33   : > { %204 = sbr.rel (%p839_p5) target bundleno = 119 (0x77), region = 28  ;;  %s855_s28 = sand.u32 (!%p839_p5), 1, %s704_s13  }
  0x34   : > { %s858_s29 = sshll.u32 (!%p839_p5), %s855_s28, 3  ;;  %s207_s30 = scalar_lea.sflag (!%p839_p5), [#allocation3], %s855_s28 }
  0x35   : > { %s210_s21 = scalar_lea.vmem (!%p839_p5), [#allocation2], %s858_s29 }
  0x38   : > { %683 = dma.done.wait (%p794_p8), %s207_s30, 128  }
  0x39   : > { %685 = vsyncadd (%p794_p8), %s207_s30, 4294967168  ;;  %s216_s9 = scalar_lea.sflag [#allocation6], %s855_s28  ;;  %s219_s22 = scalar_lea.vmem [#allocation5], %s858_s29 }
  0x3a   : > { %687 = dma.done.wait (%p794_p8), %s216_s9, 128  }
  0x3b   : > { %689 = vsyncadd (%p794_p8), %s216_s9, 4294967168  ;;  %v260_v0 = vld [vmem:[%s210_s21] sm:$0xff]  ;;  %v261_v1 = vld [vmem:[%s219_s22] sm:$0xff]  ;;  %s471_s23 = sshll.u32 %s712_s15, 7  ;;  %s251_s4 = scalar_lea.vmem [#allocation8], %s858_s29  ;;  %v724_v4 = vmov 0.0  }
  0x3c   : > { %s320_s5 = sshll.u32 %s251_s4, 4  ;;  %vm262_vm0 = vcmp.ne.f32.partialorder %v261_v1, 255.0  ;;  %v265_v2 = vmax.f32 %v260_v0, 1e-06  ;;  %v267_v3 = vmax.f32 %v261_v1, 1e-06  ;;  %s879_s11 = scalar_lea.hbm %s949_s3, %s471_s23  ;;  %s881_s5 = int_to_ptr.vmem [resolvable:$true] %s320_s5 }
  0x3d   : > { %v468_v5 = vsel %vm262_vm0, 1.0, %v724_v4  ;;  %s294_s18 = scalar_lea.sflag [#allocation9], %s855_s28  ;;  %s606_s19 = scalar_lea.vmem %s881_s5, 128 }
  0x3e   : > { %v266_v6 = vmin.f32 %v265_v2, 0.999999  ;;  %v268_v7 = vmin.f32 %v267_v3, 0.999999  ;;  %287 = vst [vmem:[%s251_s4] sm:$0xff] %v468_v5  ;;  %p607_p8 = scmp.ne.s32.totalorder %s881_s5, %s606_s19  ;;  %s725_s6 = smov [#allocation8]  }
  0x3f   : > { %s610_s8 = sshll.u32 %s725_s6, 4  ;;  %s611_s8 = int_to_ptr.vmem [resolvable:$false] %s610_s8 }
  0x40   : > { %v269_v8 = vsub.f32 1.0, %v268_v7  ;;  %v270_v9 = vsub.f32 1.0, %v266_v6  ;;  %v272_v10 = vmul.f32 %v268_v7, %v266_v6  ;;  %p608_p0 = pnand %p607_p8, %p798_p9  ;;  %s612_s10 = scalar_lea.vmem %s611_s8, 256 }
  0x41   : > { %p613_p13 = scmp.lt.s32.totalorder %s881_s5, %s611_s8  ;;  %p614_p5 = scmp.lt.s32.totalorder %s612_s10, %s606_s19 }
  0x42   : > { %p609_p3 = pneg %p608_p0 }
  0x43   : > { %p615_p12 = por %p614_p5, %p613_p13 }
  0x45   : > { %p616_p6 = pnand %p615_p12, %p609_p3 }
  0x47   : > { %619 = shalt.err (!%p616_p6)
}
  0x48   : > { %s620_s30 = scalar_lea.hbm %s879_s11, 128  ;;  %s624_s22 = scalar_lea.hbm %s949_s3, 256 }
  0x49   : > { %p621_p7 = scmp.ne.s32.totalorder %s879_s11, %s620_s30  ;;  %p625_p4 = scmp.lt.s32.totalorder %s879_s11, %s949_s3 }
  0x4a   : > { %p626_p10 = scmp.lt.s32.totalorder %s624_s22, %s620_s30 }
  0x4b   : > { %p622_p1 = pnand %p621_p7, %p798_p9 }
  0x4c   : > { %p627_p8 = por %p626_p10, %p625_p4 }
  0x4d   : > { %p623_p2 = pneg %p622_p1 }
  0x4f   : > { %p628_p0 = pnand %p627_p8, %p623_p2 }
  0x51   : > { %631 = shalt.err (!%p628_p0)
}
  0x52   : > { %480 = dma.vmem_to_hbm [thread:$0]  (%p798_p9), %s881_s5, 128, %s879_s11, %s294_s18   ;;  %v271_v11 = vmul.f32 %v270_v9, %v269_v8 }
  0x53   : > { %s244_s7 = scalar_lea.vmem [#allocation7], %s858_s29  ;;  %s305_s10 = scalar_lea.hbm %s948_s2, %s471_s23 }
  0x54   : > { %v273_v12 = vadd.f32 %v272_v10, %v271_v11  ;;  %s307_s19 = sshll.u32 %s244_s7, 4  ;;  %s289_s5 = scalar_lea.sflag [#allocation4], %s855_s28  ;;  %s308_s19 = int_to_ptr.vmem [resolvable:$true] %s307_s19 }
  0x55   : > { %s632_s11 = scalar_lea.vmem %s308_s19, 128  ;;  %s726_s18 = smov [#allocation7]  }
  0x56   : > { %548 = vlog2.f32 %v273_v12  ;;  %v274_v13 = vsub.f32 1.0, %v273_v12  ;;  %p633_p3 = scmp.ne.s32.totalorder %s308_s19, %s632_s11  ;;  %s636_s30 = sshll.u32 %s726_s18, 4  ;;  %s637_s30 = int_to_ptr.vmem [resolvable:$false] %s636_s30 }
  0x57   : > { %s638_s21 = scalar_lea.vmem %s637_s30, 256  ;;  %p639_p12 = scmp.lt.s32.totalorder %s308_s19, %s637_s30 }
  0x58   : > { %v275_v14 = vmul.f32 %v274_v13, %v274_v13  ;;  %p634_p13 = pnand %p633_p3, %p798_p9  ;;  %p640_p6 = scmp.lt.s32.totalorder %s638_s21, %s632_s11 }
  0x5a   : > { %p635_p5 = pneg %p634_p13  ;;  %p641_p7 = por %p640_p6, %p639_p12 }
  0x5c   : > { %p642_p1 = pnand %p641_p7, %p635_p5 }
  0x63   : > { %v549_v15 = vpop.eup %548 }
  0x64   : > { %v277_v16 = vmul.f32 0.6931472, %v549_v15 }
  0x66   : > { %v278_v17 = vmul.f32 %v277_v16, %v275_v14 }
  0x68   : > { %v279_v18 = vmul.f32 %v468_v5, %v278_v17 }
  0x6a   : > { %283 = vst [vmem:[%s244_s7] sm:$0xff] %v279_v18 }
  0x6b   : > { %645 = shalt.err (!%p642_p1)
}
  0x6c   : > { %s646_s15 = scalar_lea.hbm %s305_s10, 128  ;;  %s650_s23 = scalar_lea.hbm %s948_s2, 256 }
  0x6d   : > { %p647_p2 = scmp.ne.s32.totalorder %s305_s10, %s646_s15  ;;  %p651_p8 = scmp.lt.s32.totalorder %s305_s10, %s948_s2 }
  0x6e   : > { %p652_p0 = scmp.lt.s32.totalorder %s650_s23, %s646_s15 }
  0x6f   : > { %p648_p4 = pnand %p647_p2, %p798_p9 }
  0x70   : > { %p653_p3 = por %p652_p0, %p651_p8 }
  0x71   : > { %p649_p10 = pneg %p648_p4 }
  0x73   : > { %p654_p13 = pnand %p653_p3, %p649_p10 }
  0x75   : > { %657 = shalt.err (!%p654_p13)
}
  0x76   : > { %479 = dma.vmem_to_hbm [thread:$0]  (%p798_p9), %s308_s19, 128, %s305_s10, %s289_s5  }
  0x77 PF: > { %s332_s4 = sand.u32 1, %s700_s12   ;;  %p956_p5 = scmp.ge.s32.totalorder %s720_s17, 2 }
  0x78   : > { %s333_s24 = scalar_lea.sflag [#allocation4], %s332_s4 }
  0x79   : > { %p491_p12 = pnand %p956_p5, %p805_p11 }
  0x7b   : > { %p492_p6 = pneg %p491_p12 }
  0x7d   : > { %691 = dma.done.wait (%p492_p6), %s333_s24, 128  }
  0x7e   : > { %693 = vsyncadd (%p492_p6), %s333_s24, 4294967168  ;;  %s342_s7 = scalar_lea.sflag [#allocation9], %s332_s4 }
  0x7f   : > { %695 = dma.done.wait (%p492_p6), %s342_s7, 128  }
  0x80   : > { %697 = vsyncadd (%p492_p6), %s342_s7, 4294967168  ;;  %s26_s17 = sadd.s32 1, %s720_s17   ;;  %s957_s12 = smov %s704_s13 }
  0x81   : > { %p23_p7 = scmp.ge.s32.totalorder %s26_s17, 4   ;;  %s958_s13 = smov %s708_s14 }
  0x82   : > { %s959_s14 = smov %s803_s26  ;;  %s960_s15 = smov %s716_s16 }
  0x83   : > { %s961_s16 = smov %s963_s20  ;;  %25 = sbr.rel (!%p23_p7) target bundleno = 10 (0xa), region = 107 }
  0x88   :  { %347 = vsyncpa [#allocation3], 1 }
  0x89   :  { %349 = vsyncpa [#allocation3 + $0x1], 1 }
  0x8a   :  { %350 = vsyncpa [#allocation6], 1 }
  0x8b   :  { %352 = vsyncpa [#allocation6 + $0x1], 1 }
  0x8c   :  { %353 = vsyncpa [#allocation4], 1 }
  0x8d   :  { %355 = vsyncpa [#allocation4 + $0x1], 1 }
  0x8e   :  { %356 = vsyncpa [#allocation9], 1 }
  0x8f   :  { %358 = vsyncpa [#allocation9 + $0x1], 1 }

</bundles_post_ra>
